<compile_context>
chip_gen: v7x
topology: tpu7x:2x2x1
jax: 0.10.0
libtpu: 0.0.40
codegen_flags: <defaults>
</compile_context>

<pallas_src>
import functools

import jax
import jax.numpy as jnp
from jax.experimental import pallas as pl
from jax.experimental.pallas import tpu as pltpu


# ---------------------------------------------------------------------------
# Small helpers
# ---------------------------------------------------------------------------
def _round_up(x, m):
    return ((x + m - 1) // m) * m


def _row_tiling(rows, cols, bytes_per=4):
    """Pick a row-tile size for (rows, cols) elementwise/reduction kernels.

    Returns (tile_rows, padded_rows). Keeps a tile under ~2 MiB of f32
    temporaries so it fits VMEM on every TPU generation (v5e/v6e/v7x).
    """
    cap = (1 << 21) // (bytes_per * cols)
    cap = max(8, min(1024, (cap // 8) * 8))
    if rows <= cap:
        return rows, rows                       # single / full block
    for t in range(cap, 7, -8):
        if rows % t == 0:
            return t, rows
    return cap, _round_up(rows, cap)            # fallback: pad rows


def _matmul_tiles(M, K, N):
    """Adaptive tiles: divide true dims (no pad copies) whenever possible."""
    # K tile (lane dim of A block, sublane dim of B block).
    if K <= 1024:
        tk, Kp = K, K
    else:
        tk = None
        for t in (1024, 896, 768, 640, 512, 384, 256, 128):
            if K % t == 0:
                tk = t
                break
        if tk is None:
            tk = 512
        Kp = _round_up(K, tk)
    # N tile (lane dim of B / output blocks).
    if N <= 256:
        tn, Np = N, N
    else:
        tn = None
        for t in (256, 128):
            if N % t == 0:
                tn = t
                break
        if tn is None:
            tn = 128
        Np = _round_up(N, tn)
    # M tile (sublane dim of A / output blocks).
    if M <= 256:
        tm, Mp = M, M
    else:
        tm = None
        for t in (256, 128):
            if M % t == 0:
                tm = t
                break
        if tm is None:
            tm = 128
        Mp = _round_up(M, tm)
    return tm, tk, tn, Mp, Kp, Np


# ---------------------------------------------------------------------------
# Pallas kernels
# ---------------------------------------------------------------------------
def _matmul_kernel(a_ref, b_ref, o_ref, acc_ref):
    # bf16 x bf16 -> f32 accumulate on the MXU; store only on the last K step.
    @pl.when(pl.program_id(2) == 0)
    def _():
        acc_ref[...] = jnp.zeros_like(acc_ref)

    acc_ref[...] += jnp.dot(a_ref[...], b_ref[...],
                            preferred_element_type=jnp.float32)

    @pl.when(pl.program_id(2) == pl.num_programs(2) - 1)
    def _():
        o_ref[...] = acc_ref[...].astype(o_ref.dtype)


def _bn_stats_kernel(x_ref, sum_ref, ssq_ref):
    # Pass 1: per-channel sum / sum-of-squares over row tiles (f32 accumulate).
    @pl.when(pl.program_id(0) == 0)
    def _():
        sum_ref[...] = jnp.zeros_like(sum_ref)
        ssq_ref[...] = jnp.zeros_like(ssq_ref)

    x = x_ref[...].astype(jnp.float32)
    sum_ref[...] += jnp.sum(x, axis=0, keepdims=True)
    ssq_ref[...] += jnp.sum(x * x, axis=0, keepdims=True)


def _bn_apply_kernel(x_ref, sc_ref, sh_ref, o_ref, *, relu):
    # Pass 2: y = x * scale + shift (+ReLU), bf16 output.
    y = x_ref[...].astype(jnp.float32) * sc_ref[...] + sh_ref[...]
    if relu:
        y = jnp.maximum(y, 0.0)
    o_ref[...] = y.astype(o_ref.dtype)


def _bn_apply_res_kernel(x_ref, sc_ref, sh_ref, res_ref, o_ref):
    # Pass 2 (bottleneck tail): y = relu(x * scale + shift + residual).
    y = x_ref[...].astype(jnp.float32) * sc_ref[...] + sh_ref[...]
    y = y + res_ref[...].astype(jnp.float32)
    o_ref[...] = jnp.maximum(y, 0.0).astype(o_ref.dtype)


def _max9_kernel(t0, t1, t2, t3, t4, t5, t6, t7, t8, o_ref):
    # Elementwise max over the 9 pooling-window taps (row-tiled blocks).
    m = jnp.maximum(t0[...], t1[...])
    for r in (t2, t3, t4, t5, t6, t7, t8):
        m = jnp.maximum(m, r[...])
    o_ref[...] = m


def _avgpool_kernel(x_ref, o_ref):
    # x: (1, HW, C) -> mean over HW, lane-dense (1, C) output store.
    x = x_ref[...].astype(jnp.float32)
    m = jnp.sum(x, axis=1) * (1.0 / x.shape[1])
    o_ref[...] = m.astype(o_ref.dtype)


# ---------------------------------------------------------------------------
# Wrappers around pallas_call
# ---------------------------------------------------------------------------
def pallas_matmul(a, b, out_dtype=jnp.float32):
    """a: (M, K), b: (K, N) -> (M, N). bf16 MXU inputs, f32 accumulation."""
    M, K = a.shape
    K2, N = b.shape
    assert K == K2
    a = a.astype(jnp.bfloat16)
    b = b.astype(jnp.bfloat16)

    tm, tk, tn, Mp, Kp, Np = _matmul_tiles(M, K, N)
    if (Mp, Kp) != (M, K):
        a = jnp.zeros((Mp, Kp), jnp.bfloat16).at[:M, :K].set(a)
    if (Kp, Np) != (K, N):
        b = jnp.zeros((Kp, Np), jnp.bfloat16).at[:K, :N].set(b)

    grid = (Mp // tm, Np // tn, Kp // tk)
    out_bytes = jnp.dtype(out_dtype).itemsize
    cost = pl.CostEstimate(
        flops=2 * Mp * Np * Kp,
        transcendentals=0,
        bytes_accessed=Mp * Kp * 2 + Kp * Np * 2 + Mp * Np * out_bytes)

    out = pl.pallas_call(
        _matmul_kernel,
        out_shape=jax.ShapeDtypeStruct((Mp, Np), out_dtype),
        grid_spec=pltpu.PrefetchScalarGridSpec(
            num_scalar_prefetch=0,
            grid=grid,
            in_specs=[
                pl.BlockSpec((tm, tk), lambda i, j, k: (i, k)),
                pl.BlockSpec((tk, tn), lambda i, j, k: (k, j)),
            ],
            out_specs=pl.BlockSpec((tm, tn), lambda i, j, k: (i, j)),
            scratch_shapes=[pltpu.VMEM((tm, tn), jnp.float32)],
        ),
        compiler_params=pltpu.CompilerParams(
            dimension_semantics=("parallel", "parallel", "arbitrary")),
        cost_estimate=cost,
    )(a, b)

    if (Mp, Np) != (M, N):
        out = out[:M, :N]
    return out


def _extract_patches(x, kh, kw, stride, pad):
    """im2col glue: NHWC -> (N, HO, WO, kh*kw*C), tap order (ki, kj, c)."""
    n, h, w, c = x.shape
    xp = jnp.pad(x, ((0, 0), (pad, pad), (pad, pad), (0, 0)))
    ho = (h + 2 * pad - kh) // stride + 1
    wo = (w + 2 * pad - kw) // stride + 1
    cols = []
    for ki in range(kh):
        for kj in range(kw):
            cols.append(xp[:, ki:ki + stride * (ho - 1) + 1:stride,
                           kj:kj + stride * (wo - 1) + 1:stride, :])
    return jnp.concatenate(cols, axis=-1), ho, wo


def conv2d(x, w, stride=1, pad=0):
    """x: NHWC bf16, w: HWIO bf16. Lowers to a Pallas MXU matmul; bf16 out."""
    kh, kw, cin, cout = w.shape
    n = x.shape[0]
    if kh == 1 and kw == 1 and pad == 0:
        patches = x[:, ::stride, ::stride, :]
        ho, wo = patches.shape[1], patches.shape[2]
        a = patches.reshape(-1, cin)
        b = w.reshape(cin, cout)
    else:
        patches, ho, wo = _extract_patches(x, kh, kw, stride, pad)
        a = patches.reshape(-1, kh * kw * cin)
        b = w.reshape(kh * kw * cin, cout)
    out = pallas_matmul(a, b, out_dtype=jnp.bfloat16)
    return out.reshape(n, ho, wo, cout)


def batchnorm(x, gamma, beta, relu=False, residual=None):
    """Training-mode BN (batch stats, biased var) as a two-pass Pallas pipeline."""
    n, h, w, c = x.shape
    rows = n * h * w
    x2 = x.reshape(rows, c)
    tr, rows_p = _row_tiling(rows, c, bytes_per=4)

    def _pad_rows(t):
        if rows_p == rows:
            return t
        return jnp.zeros((rows_p, c), t.dtype).at[:rows].set(t)

    x2p = _pad_rows(x2)
    grid = (rows_p // tr,)
    row_spec = pl.BlockSpec((tr, c), lambda i: (i, 0))
    vec_spec = pl.BlockSpec((1, c), lambda i: (0, 0))

    # Pass 1: per-channel sum / sumsq (zero-padded rows contribute nothing).
    s, ss = pl.pallas_call(
        _bn_stats_kernel,
        out_shape=(jax.ShapeDtypeStruct((1, c), jnp.float32),
                   jax.ShapeDtypeStruct((1, c), jnp.float32)),
        grid_spec=pltpu.PrefetchScalarGridSpec(
            num_scalar_prefetch=0, grid=grid,
            in_specs=[row_spec],
            out_specs=(vec_spec, vec_spec)),
        compiler_params=pltpu.CompilerParams(
            dimension_semantics=("arbitrary",)),
    )(x2p)

    # Tiny (1, C) glue: fold mean/var/gamma/beta into scale & shift.
    inv_r = 1.0 / rows
    mean = s * inv_r
    var = jnp.maximum(ss * inv_r - mean * mean, 0.0)   # biased variance
    scale = gamma.reshape(1, c).astype(jnp.float32) * jax.lax.rsqrt(var + 1e-5)
    shift = beta.reshape(1, c).astype(jnp.float32) - mean * scale

    # Pass 2: normalize (+residual, +ReLU), bf16 output.
    if residual is None:
        kern = functools.partial(_bn_apply_kernel, relu=relu)
        in_specs = [row_spec, vec_spec, vec_spec]
        args = (x2p, scale, shift)
    else:
        kern = _bn_apply_res_kernel
        r2p = _pad_rows(residual.reshape(rows, c))
        in_specs = [row_spec, vec_spec, vec_spec, row_spec]
        args = (x2p, scale, shift, r2p)

    out = pl.pallas_call(
        kern,
        out_shape=jax.ShapeDtypeStruct((rows_p, c), x.dtype),
        grid_spec=pltpu.PrefetchScalarGridSpec(
            num_scalar_prefetch=0, grid=grid,
            in_specs=in_specs, out_specs=row_spec),
        compiler_params=pltpu.CompilerParams(
            dimension_semantics=("parallel",)),
    )(*args)

    if rows_p > rows:
        out = out[:rows]
    return out.reshape(n, h, w, c)


def maxpool2d(x, k=3, stride=2, pad=1):
    n, h, w, c = x.shape
    xp = jnp.pad(x, ((0, 0), (pad, pad), (pad, pad), (0, 0)),
                 constant_values=-1e38)
    ho = (h + 2 * pad - k) // stride + 1
    wo = (w + 2 * pad - k) // stride + 1

    taps = []
    for ki in range(k):
        for kj in range(k):
            t = xp[:, ki:ki + stride * (ho - 1) + 1:stride,
                   kj:kj + stride * (wo - 1) + 1:stride, :]
            taps.append(t.reshape(n * ho * wo, c))

    rows = n * ho * wo
    tr, rows_p = _row_tiling(rows, c, bytes_per=2)
    if rows_p > rows:
        taps = [jnp.zeros((rows_p, c), x.dtype).at[:rows].set(t) for t in taps]

    spec = pl.BlockSpec((tr, c), lambda i: (i, 0))
    out = pl.pallas_call(
        _max9_kernel,
        out_shape=jax.ShapeDtypeStruct((rows_p, c), x.dtype),
        grid_spec=pltpu.PrefetchScalarGridSpec(
            num_scalar_prefetch=0, grid=(rows_p // tr,),
            in_specs=[spec] * 9, out_specs=spec),
        compiler_params=pltpu.CompilerParams(
            dimension_semantics=("parallel",)),
    )(*taps)

    if rows_p > rows:
        out = out[:rows]
    return out.reshape(n, ho, wo, c)


def global_avgpool(x):
    n, h, w, c = x.shape
    x3 = x.reshape(n, h * w, c)
    return pl.pallas_call(
        _avgpool_kernel,
        out_shape=jax.ShapeDtypeStruct((n, c), x.dtype),
        grid_spec=pltpu.PrefetchScalarGridSpec(
            num_scalar_prefetch=0, grid=(n,),
            in_specs=[pl.BlockSpec((1, h * w, c), lambda i: (i, 0, 0))],
            out_specs=pl.BlockSpec((1, c), lambda i: (i, 0))),
        compiler_params=pltpu.CompilerParams(
            dimension_semantics=("parallel",)),
    )(x3)


# ---------------------------------------------------------------------------
# Deterministic parameter construction (synthetic weights, He-style init)
# ---------------------------------------------------------------------------
class _KeyGen:
    def __init__(self, key):
        self._key = key

    def __call__(self):
        self._key, sub = jax.random.split(self._key)
        return sub


def _conv_init(kg, kh, kw, cin, cout):
    fan_in = kh * kw * cin
    w = jax.random.normal(kg(), (kh, kw, cin, cout), jnp.float32) * \
        (2.0 / fan_in) ** 0.5
    return w.astype(jnp.bfloat16)     # weights stored bf16 (MXU-native)


def _bn_init(c):
    return jnp.ones((c,), jnp.float32), jnp.zeros((c,), jnp.float32)


def _make_bottleneck(kg, inplanes, planes, stride, downsample):
    p = {
        "w1": _conv_init(kg, 1, 1, inplanes, planes),
        "bn1": _bn_init(planes),
        "w2": _conv_init(kg, 3, 3, planes, planes),
        "bn2": _bn_init(planes),
        "w3": _conv_init(kg, 1, 1, planes, planes * 4),
        "bn3": _bn_init(planes * 4),
        "stride": stride,
    }
    if downsample:
        p["wd"] = _conv_init(kg, 1, 1, inplanes, planes * 4)
        p["bnd"] = _bn_init(planes * 4)
    return p


def make_resnet50_params(key, num_classes):
    kg = _KeyGen(key)
    params = {
        "conv1": _conv_init(kg, 7, 7, 3, 64),
        "bn1": _bn_init(64),
        "layers": [],
    }
    inplanes = 64
    for planes, blocks, stride in [(64, 3, 1), (128, 4, 2),
                                   (256, 6, 2), (512, 3, 2)]:
        blks = []
        for bi in range(blocks):
            s = stride if bi == 0 else 1
            ds = (bi == 0)    # stride != 1 or inplanes != planes*4 on 1st block
            blks.append(_make_bottleneck(kg, inplanes, planes, s, ds))
            inplanes = planes * 4
        params["layers"].append(blks)
    params["fc_w"] = (jax.random.normal(kg(), (2048, num_classes), jnp.float32)
                      * (1.0 / 2048.0) ** 0.5).astype(jnp.bfloat16)
    params["fc_b"] = jnp.zeros((num_classes,), jnp.float32)
    return params


# ---------------------------------------------------------------------------
# Forward pass
# ---------------------------------------------------------------------------
def _bottleneck_forward(x, p):
    identity = x
    out = conv2d(x, p["w1"])
    out = batchnorm(out, *p["bn1"], relu=True)
    out = conv2d(out, p["w2"], stride=p["stride"], pad=1)
    out = batchnorm(out, *p["bn2"], relu=True)
    out = conv2d(out, p["w3"])
    if "wd" in p:
        identity = conv2d(x, p["wd"], stride=p["stride"])
        identity = batchnorm(identity, *p["bnd"], relu=False)
    return batchnorm(out, *p["bn3"], residual=identity)


def resnet50_forward(x_nchw, params):
    # NCHW -> NHWC (layout glue), bf16 activations end-to-end.
    x = jnp.transpose(x_nchw, (0, 2, 3, 1)).astype(jnp.bfloat16)
    x = conv2d(x, params["conv1"], stride=2, pad=3)   # 7x7/2
    x = batchnorm(x, *params["bn1"], relu=True)
    x = maxpool2d(x, k=3, stride=2, pad=1)
    for blks in params["layers"]:
        for p in blks:
            x = _bottleneck_forward(x, p)
    pooled = global_avgpool(x)                        # (N, 2048) bf16
    logits = pallas_matmul(pooled, params["fc_w"],
                           out_dtype=jnp.float32)     # fc matmul on MXU
    logits = logits + params["fc_b"]                  # bias add (glue)
    return logits


if __name__ == "__main__":
    num_classes = 10
    root = jax.random.PRNGKey(0)
    k_in, k_par = jax.random.split(root)
    params = make_resnet50_params(k_par, num_classes)
    x = jax.random.normal(k_in, (2, 3, 32, 32), jnp.float32)  # NCHW like PyTorch
    logits = resnet50_forward(x, params)
    logits = jax.block_until_ready(logits)
    assert logits.shape == (2, num_classes)
    assert bool(jnp.all(jnp.isfinite(logits)))
    print("KERNEL_OK")
</pallas_src>

<mosaic_0001>
module attributes {stable_mosaic.version = 11 : i64} {
  func.func @_matmul_kernel(%arg0: i32, %arg1: i32, %arg2: i32, %arg3: memref<256x147xbf16, #tpu.memory_space<vmem>>, %arg4: memref<147x64xbf16, #tpu.memory_space<vmem>>, %arg5: memref<256x64xbf16, #tpu.memory_space<vmem>>, %arg6: memref<256x64xf32, #tpu.memory_space<vmem>>) attributes {dimension_semantics = [#tpu.dimension_semantics<parallel>, #tpu.dimension_semantics<parallel>, #tpu.dimension_semantics<arbitrary>], iteration_bounds = array<i64: 2, 1, 1>, scalar_prefetch = 0 : i64, scratch_operands = 1 : i64, tpu.core_type = #tpu.core_type<tc>, window_params = [{transform_indices = @transform_0, window_bounds = array<i64: 256, 147>}, {transform_indices = @transform_1, window_bounds = array<i64: 147, 64>}, {transform_indices = @transform_2, window_bounds = array<i64: 256, 64>}]} {
    %c0_i32 = arith.constant 0 : i32
    %0 = arith.cmpi eq, %arg2, %c0_i32 : i32
    %1 = arith.extui %0 : i1 to i32
    %c0_i32_0 = arith.constant 0 : i32
    %2 = arith.cmpi ne, %1, %c0_i32_0 : i32
    scf.if %2 {
      %cst_10 = arith.constant 0.000000e+00 : f32
      %12 = vector.broadcast %cst_10 : f32 to vector<256x64xf32>
      %c0_11 = arith.constant 0 : index
      %c0_12 = arith.constant 0 : index
      %13 = vector.load %arg6[%c0_11, %c0_12] : memref<256x64xf32, #tpu.memory_space<vmem>>, vector<256x64xf32>
      tpu.vector_store %arg6[%c0_11, %c0_12], %12 {strides = array<i32>} : memref<256x64xf32, #tpu.memory_space<vmem>>, vector<256x64xf32>,
    } else {
    }
    %c0 = arith.constant 0 : index
    %c0_1 = arith.constant 0 : index
    %3 = vector.load %arg6[%c0, %c0_1] : memref<256x64xf32, #tpu.memory_space<vmem>>, vector<256x64xf32>
    %c0_2 = arith.constant 0 : index
    %c0_3 = arith.constant 0 : index
    %4 = vector.load %arg3[%c0_2, %c0_3] : memref<256x147xbf16, #tpu.memory_space<vmem>>, vector<256x147xbf16>
    %c0_4 = arith.constant 0 : index
    %c0_5 = arith.constant 0 : index
    %5 = vector.load %arg4[%c0_4, %c0_5] : memref<147x64xbf16, #tpu.memory_space<vmem>>, vector<147x64xbf16>
    %cst = arith.constant dense<0.000000e+00> : vector<256x64xf32>
    %6 = tpu.matmul %4, %5, %cst {dimension_numbers = #tpu.dot_dimension_numbers<[1], [0], [0], [1], [0, 0, 1, 1], [], []>} : vector<256x147xbf16>, vector<147x64xbf16>, vector<256x64xf32> -> vector<256x64xf32>
    %7 = arith.addf %3, %6 : vector<256x64xf32>
    %c0_6 = arith.constant 0 : index
    %c0_7 = arith.constant 0 : index
    %8 = vector.load %arg6[%c0_6, %c0_7] : memref<256x64xf32, #tpu.memory_space<vmem>>, vector<256x64xf32>
    tpu.vector_store %arg6[%c0_6, %c0_7], %7 {strides = array<i32>} : memref<256x64xf32, #tpu.memory_space<vmem>>, vector<256x64xf32>,
    %c0_i32_8 = arith.constant 0 : i32
    %9 = arith.cmpi eq, %arg2, %c0_i32_8 : i32
    %10 = arith.extui %9 : i1 to i32
    %c0_i32_9 = arith.constant 0 : i32
    %11 = arith.cmpi ne, %10, %c0_i32_9 : i32
    scf.if %11 {
      %c0_10 = arith.constant 0 : index
      %c0_11 = arith.constant 0 : index
      %12 = vector.load %arg6[%c0_10, %c0_11] : memref<256x64xf32, #tpu.memory_space<vmem>>, vector<256x64xf32>
      %13 = arith.truncf %12 : vector<256x64xf32> to vector<256x64xbf16>
      %c0_12 = arith.constant 0 : index
      %c0_13 = arith.constant 0 : index
      %14 = vector.load %arg5[%c0_12, %c0_13] : memref<256x64xbf16, #tpu.memory_space<vmem>>, vector<256x64xbf16>
      tpu.vector_store %arg5[%c0_12, %c0_13], %13 {strides = array<i32>} : memref<256x64xbf16, #tpu.memory_space<vmem>>, vector<256x64xbf16>,
    } else {
    }
    return
  }
  func.func @transform_0(%arg0: i32, %arg1: i32, %arg2: i32) -> (i32, i32) {
    %c0_i32 = arith.constant 0 : i32
    return %arg0, %arg2 : i32, i32
  }
  func.func @transform_1(%arg0: i32, %arg1: i32, %arg2: i32) -> (i32, i32) {
    %c0_i32 = arith.constant 0 : i32
    return %arg2, %arg1 : i32, i32
  }
  func.func @transform_2(%arg0: i32, %arg1: i32, %arg2: i32) -> (i32, i32) {
    %c0_i32 = arith.constant 0 : i32
    return %arg0, %arg1 : i32, i32
  }
}

</mosaic_0001>

<bundles_post_ra>
// kernel: tpu_custom_call.1
= control target key start
LH: loop header
LB: loop body
LE: loop exit
PB: predicated region body
PF: predicated region fallthrough
CT: control target
= control target key end

     0   :  { %s1411_s9 = smov 0   ;;  %s1413_s10 = smov 0   ;;  %s1680_s0 = inlined_call_operand.vmem [shape: bf16[512,147], index: 0, kind: input, shape index: {}]   ;;  %s1681_s1 = inlined_call_operand.vmem [shape: bf16[147,64], index: 1, kind: input, shape index: {}]   ;;  %s1682_s2 = inlined_call_operand.vmem [shape: bf16[512,64], index: 2, kind: output, shape index: {}]  }
   0x1   :  { %s1415_s11 = smov 0  }
   0x2 LB: > { %s31_s12 = sadd.s32 1, %s1387_s10  ;;  %p1133_p0 = scmp.ge.s32.totalorder %s1391_s11, 1  ;;  %s1391_s11 = sphi %s1415_s11, %s12_s11   ;;  %s1387_s10 = sphi %s1413_s10, %s1684_s10   ;;  %s1383_s9 = sphi %s1411_s9, %s1683_s9  }
   0x3   : > { %p33_p1 = scmp.ge.s32.totalorder %s31_s12, 2  ;;  %p158_p2 = scmp.lt.s32.totalorder %s1391_s11, 3 }
   0x5   : > { %s1686_s12 = smov (%p33_p1, %s31_s12), 0  ;;  %p159_p3 = pnand %p1133_p0, %p158_p2 }
   0x6   : > { %v1311_v0 = vld [vmem:[%s1681_s1] sm:$0xff] (!%p159_p3)   ;;  %v1393_v1 = vmov (!%p159_p3), 0   ;;  %v1312_v2 = vld [vmem:[%s1681_s1 + $0x8] sm:$0xff] (!%p159_p3)   ;;  %v1313_v3 = vld [vmem:[%s1681_s1 + $0x10] sm:$0xff] (!%p159_p3)   ;;  %s1134_s19 = sshll.u32 (!%p159_p3), %s1383_s9, 5  ;;  %vm231_vm0 = vcmask (!%p159_p3), 523264  }
   0x7   : > { %162 = sbr.rel (%p159_p3) target bundleno = 333 (0x14d), region = 28  ;;  %604 = vmatprep.subr.bf16.mxu0 (!%p159_p3), %v1393_v1  ;;  %1264 = vmatprep.subr.bf16.mxu1 (!%p159_p3), %v1393_v1  ;;  %p198_p4 = scmp.lt.s32.totalorder (!%p159_p3), %s1134_s19, 63  ;;  %v1314_v4 = vld [vmem:[%s1681_s1 + $0x18] sm:$0xff] (!%p159_p3)   ;;  %v1394_v5 = vmov (!%p159_p3), 0.0   ;;  %v1315_v6 = vld [vmem:[%s1681_s1 + $0x20] sm:$0xff] (!%p159_p3)   ;;  %vm548_vm1 = vcmask (!%p159_p3), 154624  }
   0x8   : > { %605 = vmatpush1.bf16.msra.mxu0 (!%p159_p3), %v1311_v0  ;;  %1274 = vmatpush1.bf16.msra.mxu1 (!%p159_p3), %v1311_v0  ;;  %232 = vst.msk [vmem:[#allocation2] sm:$0xff] (!%p159_p3), %vm231_vm0, %v1394_v5  ;;  %233 = vst.msk [vmem:[#allocation2 + $0x8] sm:$0xff] (!%p159_p3), %vm231_vm0, %v1394_v5  ;;  %v1316_v9 = vld [vmem:[%s1681_s1 + $0x28] sm:$0xff] (!%p159_p3)   ;;  %v1317_v10 = vld [vmem:[%s1681_s1 + $0x30] sm:$0xff] (!%p159_p3)   ;;  %vm597_vm2 = vcmask (!%p159_p3), 1040384   ;;  %vm598_vm3 = vcmask (!%p159_p3), 1041408  }
   0x9   : > { %606 = vmatprep.subr.bf16.mxu0 (!%p159_p3), %v1393_v1  ;;  %1265 = vmatprep.subr.bf16.mxu1 (!%p159_p3), %v1393_v1  ;;  %234 = vst.msk [vmem:[#allocation2 + $0x10] sm:$0xff] (!%p159_p3), %vm231_vm0, %v1394_v5  ;;  %235 = vst.msk [vmem:[#allocation2 + $0x18] sm:$0xff] (!%p159_p3), %vm231_vm0, %v1394_v5  ;;  %v1318_v11 = vld [vmem:[%s1681_s1 + $0x38] sm:$0xff] (!%p159_p3)   ;;  %v1395_v12 = vmov (!%p159_p3), 65535   ;;  %v1319_v14 = vld [vmem:[%s1681_s1 + $0x40] sm:$0xff] (!%p159_p3)   ;;  %vm993_vm4 = vcmask (!%p159_p3), 519168  }
   0xa   : > { %236 = vst.msk [vmem:[#allocation2 + $0x20] sm:$0xff] (!%p159_p3), %vm231_vm0, %v1394_v5  ;;  %237 = vst.msk [vmem:[#allocation2 + $0x28] sm:$0xff] (!%p159_p3), %vm231_vm0, %v1394_v5  ;;  %v599_v13 = vsel (!%p159_p3), %vm597_vm2, 4294967295, %v1395_v12  ;;  %v1320_v15 = vld [vmem:[%s1681_s1 + $0x48] ss:$0 sps:$4 sm:$0x33] (!%p159_p3)  }
   0xb   : > { %238 = vst.msk [vmem:[#allocation2 + $0x30] sm:$0xff] (!%p159_p3), %vm231_vm0, %v1394_v5  ;;  %239 = vst.msk [vmem:[#allocation2 + $0x38] sm:$0xff] (!%p159_p3), %vm231_vm0, %v1394_v5  ;;  %v600_v16 = vsel (!%p159_p3), %vm598_vm3, %v599_v13, 0 }
   0xc   : > { %607 = vmatpush1.bf16.msra.mxu0 (!%p159_p3), %v1312_v2  ;;  %1275 = vmatpush1.bf16.msra.mxu1 (!%p159_p3), %v1312_v2  ;;  %240 = vst.msk [vmem:[#allocation2 + $0x40] sm:$0xff] (!%p159_p3), %vm231_vm0, %v1394_v5  ;;  %241 = vst.msk [vmem:[#allocation2 + $0x48] sm:$0xff] (!%p159_p3), %vm231_vm0, %v1394_v5  ;;  %v602_v17 = vand.u32 (!%p159_p3), %v1320_v15, %v600_v16 }
   0xd   : > { %608 = vmatprep.subr.bf16.mxu0 (!%p159_p3), %v1393_v1  ;;  %1266 = vmatprep.subr.bf16.mxu1 (!%p159_p3), %v1393_v1  ;;  %242 = vst.msk [vmem:[#allocation2 + $0x50] sm:$0xff] (!%p159_p3), %vm231_vm0, %v1394_v5  ;;  %243 = vst.msk [vmem:[#allocation2 + $0x58] sm:$0xff] (!%p159_p3), %vm231_vm0, %v1394_v5 }
   0xe   : > { %s1688_s19 = smov (!%p198_p4, %s1134_s19), 63  ;;  %244 = vst.msk [vmem:[#allocation2 + $0x60] sm:$0xff] %vm231_vm0, %v1394_v5  ;;  %245 = vst.msk [vmem:[#allocation2 + $0x68] sm:$0xff] %vm231_vm0, %v1394_v5 }
   0xf   : > { %s1231_s22 = sshll.u32 %s1688_s19, 3  ;;  %246 = vst.msk [vmem:[#allocation2 + $0x70] sm:$0xff] %vm231_vm0, %v1394_v5  ;;  %247 = vst.msk [vmem:[#allocation2 + $0x78] sm:$0xff] %vm231_vm0, %v1394_v5  ;;  %v264_v48 = vld [vmem:[#allocation2] sm:$0xff]  ;;  %v265_v52 = vld [vmem:[#allocation2 + $0x8] sm:$0xff]  ;;  %s1138_s13 = sshll.u32 %s1688_s19, 2 }
  0x10   : > { %609 = vmatpush1.bf16.msra.mxu0 %v1313_v3  ;;  %1276 = vmatpush1.bf16.msra.mxu1 %v1313_v3  ;;  %248 = vst.msk [vmem:[#allocation2 + $0x80] sm:$0xff] %vm231_vm0, %v1394_v5  ;;  %249 = vst.msk [vmem:[#allocation2 + $0x88] sm:$0xff] %vm231_vm0, %v1394_v5  ;;  %s1489_s25 = scalar_lea.vmem %s1680_s0, %s1231_s22  ;;  %v266_v0 = vld [vmem:[#allocation2 + $0x10] sm:$0xff]  ;;  %s1577_s16 = scalar_lea.vmem %s1682_s2, %s1138_s13 }
  0x11   : > { %610 = vmatprep.subr.bf16.mxu0 %v1393_v1  ;;  %1267 = vmatprep.subr.bf16.mxu1 %v1393_v1  ;;  %250 = vst.msk [vmem:[#allocation2 + $0x90] sm:$0xff] %vm231_vm0, %v1394_v5  ;;  %251 = vst.msk [vmem:[#allocation2 + $0x98] sm:$0xff] %vm231_vm0, %v1394_v5  ;;  %v1323_v7 = vld [vmem:[%s1489_s25 + $0x4] ss:$8 sps:$4 sm:$0xff]   ;;  %v1321_v18 = vld [vmem:[%s1489_s25] ss:$8 sps:$4 sm:$0xff]  }
  0x12   : > { %252 = vst.msk [vmem:[#allocation2 + $0xa0] sm:$0xff] %vm231_vm0, %v1394_v5  ;;  %253 = vst.msk [vmem:[#allocation2 + $0xa8] sm:$0xff] %vm231_vm0, %v1394_v5  ;;  %v1326_v8 = vld [vmem:[%s1489_s25 + $0x84] ss:$8 sps:$4 sm:$0xff]   ;;  %1181 = vmatprep.mubr.msk.bf16.mxu0 %vm548_vm1, %v1323_v7  ;;  %v1324_v19 = vld [vmem:[%s1489_s25 + $0x80] ss:$8 sps:$4 sm:$0xff]  }
  0x13   : > { %254 = vst.msk [vmem:[#allocation2 + $0xb0] sm:$0xff] %vm231_vm0, %v1394_v5  ;;  %255 = vst.msk [vmem:[#allocation2 + $0xb8] sm:$0xff] %vm231_vm0, %v1394_v5  ;;  %1189 = vmatprep.mubr.msk.bf16.mxu1 %vm548_vm1, %v1326_v8  ;;  %v1327_v20 = vld [vmem:[%s1489_s25 + $0x14] ss:$8 sps:$4 sm:$0xff]   ;;  %v1331_v22 = vld [vmem:[%s1489_s25 + $0x10] ss:$8 sps:$4 sm:$0xff]  }
  0x14   : > { %256 = vst.msk [vmem:[#allocation2 + $0xc0] sm:$0xff] %vm231_vm0, %v1394_v5  ;;  %257 = vst.msk [vmem:[#allocation2 + $0xc8] sm:$0xff] %vm231_vm0, %v1394_v5  ;;  %611 = vmatpush1.bf16.msra.mxu0 %v1314_v4  ;;  %1277 = vmatpush1.bf16.msra.mxu1 %v1314_v4  ;;  %v1329_v21 = vld [vmem:[%s1489_s25 + $0x94] ss:$8 sps:$4 sm:$0xff]   ;;  %v1332_v23 = vld [vmem:[%s1489_s25 + $0x90] ss:$8 sps:$4 sm:$0xff]  }
  0x15   : > { %258 = vst.msk [vmem:[#allocation2 + $0xd0] sm:$0xff] %vm231_vm0, %v1394_v5  ;;  %259 = vst.msk [vmem:[#allocation2 + $0xd8] sm:$0xff] %vm231_vm0, %v1394_v5  ;;  %612 = vmatprep.subr.bf16.mxu0 %v1393_v1  ;;  %1268 = vmatprep.subr.bf16.mxu1 %v1393_v1  ;;  %v1333_v24 = vld [vmem:[%s1489_s25 + $0x24] ss:$8 sps:$4 sm:$0xff]   ;;  %v1337_v26 = vld [vmem:[%s1489_s25 + $0x20] ss:$8 sps:$4 sm:$0xff]  }
  0x16   : > { %260 = vst.msk [vmem:[#allocation2 + $0xe0] sm:$0xff] %vm231_vm0, %v1394_v5  ;;  %261 = vst.msk [vmem:[#allocation2 + $0xe8] sm:$0xff] %vm231_vm0, %v1394_v5  ;;  %v1335_v25 = vld [vmem:[%s1489_s25 + $0xa4] ss:$8 sps:$4 sm:$0xff]   ;;  %v1338_v27 = vld [vmem:[%s1489_s25 + $0xa0] ss:$8 sps:$4 sm:$0xff]  }
  0x17   : > { %262 = vst.msk [vmem:[#allocation2 + $0xf0] sm:$0xff] %vm231_vm0, %v1394_v5  ;;  %263 = vst.msk [vmem:[#allocation2 + $0xf8] sm:$0xff] %vm231_vm0, %v1394_v5  ;;  %v1339_v28 = vld [vmem:[%s1489_s25 + $0x34] ss:$8 sps:$4 sm:$0xff]   ;;  %v1343_v30 = vld [vmem:[%s1489_s25 + $0x30] ss:$8 sps:$4 sm:$0xff]  }
  0x18   : > { %613 = vmatpush1.bf16.msra.mxu0 %v1315_v6  ;;  %1278 = vmatpush1.bf16.msra.mxu1 %v1315_v6  ;;  %v1341_v29 = vld [vmem:[%s1489_s25 + $0xb4] ss:$8 sps:$4 sm:$0xff]   ;;  %v1344_v31 = vld [vmem:[%s1489_s25 + $0xb0] ss:$8 sps:$4 sm:$0xff]   ;;  %v1345_v32 = vld [vmem:[%s1489_s25 + $0x44] ss:$8 sps:$4 sm:$0xff]  }
  0x19   : > { %614 = vmatprep.subr.bf16.mxu0 %v1393_v1  ;;  %1269 = vmatprep.subr.bf16.mxu1 %v1393_v1  ;;  %v1347_v33 = vld [vmem:[%s1489_s25 + $0xc4] ss:$8 sps:$4 sm:$0xff]   ;;  %v1349_v34 = vld [vmem:[%s1489_s25 + $0x40] ss:$8 sps:$4 sm:$0xff]   ;;  %v1351_v36 = vld [vmem:[%s1489_s25 + $0x54] ss:$8 sps:$4 sm:$0xff]  }
  0x1a   : > { %v1350_v35 = vld [vmem:[%s1489_s25 + $0xc0] ss:$8 sps:$4 sm:$0xff]   ;;  %v1353_v37 = vld [vmem:[%s1489_s25 + $0xd4] ss:$8 sps:$4 sm:$0xff]   ;;  %v1355_v38 = vld [vmem:[%s1489_s25 + $0x50] ss:$8 sps:$4 sm:$0xff]  }
  0x1b   : > { %v1356_v39 = vld [vmem:[%s1489_s25 + $0xd0] ss:$8 sps:$4 sm:$0xff]   ;;  %v1357_v40 = vld [vmem:[%s1489_s25 + $0x64] ss:$8 sps:$4 sm:$0xff]   ;;  %v1361_v42 = vld [vmem:[%s1489_s25 + $0x60] ss:$8 sps:$4 sm:$0xff]  }
  0x1c   : > { %615 = vmatpush1.bf16.msra.mxu0 %v1316_v9  ;;  %1279 = vmatpush1.bf16.msra.mxu1 %v1316_v9  ;;  %v1359_v41 = vld [vmem:[%s1489_s25 + $0xe4] ss:$8 sps:$4 sm:$0xff]   ;;  %v1362_v43 = vld [vmem:[%s1489_s25 + $0xe0] ss:$8 sps:$4 sm:$0xff]   ;;  %v1363_v44 = vld [vmem:[%s1489_s25 + $0x74] ss:$8 sps:$4 sm:$0xff]  }
  0x1d   : > { %616 = vmatprep.subr.bf16.mxu0 %v1393_v1  ;;  %1270 = vmatprep.subr.bf16.mxu1 %v1393_v1  ;;  %v1365_v45 = vld [vmem:[%s1489_s25 + $0xf4] ss:$8 sps:$4 sm:$0xff]   ;;  %v1367_v46 = vld [vmem:[%s1489_s25 + $0x70] ss:$8 sps:$4 sm:$0xff]   ;;  %v280_v49 = vld [vmem:[#allocation2 + $0x80] sm:$0xff] }
  0x1e   : > { %v1368_v47 = vld [vmem:[%s1489_s25 + $0xf0] ss:$8 sps:$4 sm:$0xff]   ;;  %v281_v53 = vld [vmem:[#allocation2 + $0x88] sm:$0xff] }
  0x1f   : > { %v267_v4 = vld [vmem:[#allocation2 + $0x18] sm:$0xff] }
  0x20   : > { %617 = vmatpush1.bf16.msra.mxu0 %v1317_v10  ;;  %1280 = vmatpush1.bf16.msra.mxu1 %v1317_v10  ;;  %v283_v5 = vld [vmem:[#allocation2 + $0x98] sm:$0xff] }
  0x21   : > { %618 = vmatprep.subr.bf16.mxu0 %v1393_v1  ;;  %1271 = vmatprep.subr.bf16.mxu1 %v1393_v1 }
  0x24   : > { %619 = vmatpush1.bf16.msra.mxu0 %v1318_v11  ;;  %1281 = vmatpush1.bf16.msra.mxu1 %v1318_v11 }
  0x25   : > { %620 = vmatprep.subr.bf16.mxu0 %v1393_v1  ;;  %1272 = vmatprep.subr.bf16.mxu1 %v1393_v1 }
  0x28   : > { %621 = vmatpush1.bf16.msra.mxu0 %v1319_v14  ;;  %1282 = vmatpush1.bf16.msra.mxu1 %v1319_v14 }
  0x29   : > { %622 = vmatprep.subr.bf16.mxu0 %v1393_v1  ;;  %1273 = vmatprep.subr.bf16.mxu1 %v1393_v1  ;;  %v282_v1 = vld [vmem:[#allocation2 + $0x90] sm:$0xff] }
  0x2c   : > { %623 = vmatpush1.bf16.msra.mxu0 %v602_v17  ;;  %1283 = vmatpush1.bf16.msra.mxu1 %v602_v17 }
  0x2f   : > { %637 = vmatmul.mubr.bf16.vlgmr.msra.gmra.mrb[0].mxu0 %v1321_v18  ;;  %701 = vmatmul.mubr.bf16.vlgmr.msra.gmra.mrb[0].mxu1 %v1324_v19 }
  0x30   : > { %1182 = vmatprep.mubr.msk.bf16.mxu0 %vm548_vm1, %v1327_v20  ;;  %1190 = vmatprep.mubr.msk.bf16.mxu1 %vm548_vm1, %v1329_v21 }
  0x37   : > { %645 = vmatmul.mubr.bf16.gmra.mrb[4].mxu0 %v1331_v22  ;;  %709 = vmatmul.mubr.bf16.gmra.mrb[4].mxu1 %v1332_v23 }
  0x38   : > { %1183 = vmatprep.mubr.msk.bf16.mxu0 %vm548_vm1, %v1333_v24  ;;  %1191 = vmatprep.mubr.msk.bf16.mxu1 %vm548_vm1, %v1335_v25  ;;  %v268_v24 = vld [vmem:[#allocation2 + $0x20] sm:$0xff] }
  0x39   : > { %v284_v25 = vld [vmem:[#allocation2 + $0xa0] sm:$0xff] }
  0x3f   : > { %653 = vmatmul.mubr.bf16.gmra.mrb[8].mxu0 %v1337_v26  ;;  %717 = vmatmul.mubr.bf16.gmra.mrb[8].mxu1 %v1338_v27 }
  0x40   : > { %1184 = vmatprep.mubr.msk.bf16.mxu0 %vm548_vm1, %v1339_v28  ;;  %1192 = vmatprep.mubr.msk.bf16.mxu1 %vm548_vm1, %v1341_v29  ;;  %v269_v28 = vld [vmem:[#allocation2 + $0x28] sm:$0xff] }
  0x41   : > { %v285_v29 = vld [vmem:[#allocation2 + $0xa8] sm:$0xff] }
  0x47   : > { %661 = vmatmul.mubr.bf16.gmra.mrb[12].mxu0 %v1343_v30  ;;  %725 = vmatmul.mubr.bf16.gmra.mrb[12].mxu1 %v1344_v31 }
  0x48   : > { %1185 = vmatprep.mubr.msk.bf16.mxu0 %vm548_vm1, %v1345_v32  ;;  %1193 = vmatprep.mubr.msk.bf16.mxu1 %vm548_vm1, %v1347_v33 }
  0x4f   : > { %669 = vmatmul.mubr.bf16.gmra.mrb[16].mxu0 %v1349_v34  ;;  %733 = vmatmul.mubr.bf16.gmra.mrb[16].mxu1 %v1350_v35 }
  0x50   : > { %1186 = vmatprep.mubr.msk.bf16.mxu0 %vm548_vm1, %v1351_v36  ;;  %1194 = vmatprep.mubr.msk.bf16.mxu1 %vm548_vm1, %v1353_v37 }
  0x57   : > { %677 = vmatmul.mubr.bf16.gmra.mrb[20].mxu0 %v1355_v38  ;;  %741 = vmatmul.mubr.bf16.gmra.mrb[20].mxu1 %v1356_v39 }
  0x58   : > { %1187 = vmatprep.mubr.msk.bf16.mxu0 %vm548_vm1, %v1357_v40  ;;  %1195 = vmatprep.mubr.msk.bf16.mxu1 %vm548_vm1, %v1359_v41 }
  0x5f   : > { %685 = vmatmul.mubr.bf16.gmra.mrb[24].mxu0 %v1361_v42  ;;  %749 = vmatmul.mubr.bf16.gmra.mrb[24].mxu1 %v1362_v43 }
  0x60   : > { %1188 = vmatprep.mubr.msk.bf16.mxu0 %vm548_vm1, %v1363_v44  ;;  %1196 = vmatprep.mubr.msk.bf16.mxu1 %vm548_vm1, %v1365_v45 }
  0x67   : > { %693 = vmatmul.mubr.bf16.gmra.mrb[28].mxu0 %v1367_v46  ;;  %757 = vmatmul.mubr.bf16.gmra.mrb[28].mxu1 %v1368_v47 }
 0x102   : > { %v638_v50 = vpop.f32.mrb[0].mxu0  ;;  %v702_v51 = vpop.f32.mrb[0].mxu1 }
 0x103   : > { %v765_v54 = vadd.f32 %v638_v50, %v264_v48  ;;  %v781_v55 = vadd.f32 %v702_v51, %v280_v49  ;;  %v640_v56 = vpop.f32.mrb[1].mxu0  ;;  %v704_v57 = vpop.f32.mrb[1].mxu1  ;;  %v270_v48 = vld [vmem:[#allocation2 + $0x30] sm:$0xff] }
 0x104   : > { %v641_v58 = vpop.f32.mrb[2].mxu0  ;;  %v705_v59 = vpop.f32.mrb[2].mxu1  ;;  %v286_v49 = vld [vmem:[#allocation2 + $0xb0] sm:$0xff] }
 0x105   : > { %798 = vst.msk [vmem:[#allocation2] sm:$0xff] %vm231_vm0, %v765_v54  ;;  %814 = vst.msk [vmem:[#allocation2 + $0x80] sm:$0xff] %vm231_vm0, %v781_v55  ;;  %v766_v60 = vadd.f32 %v641_v58, %v265_v52  ;;  %v782_v61 = vadd.f32 %v705_v59, %v281_v53  ;;  %v643_v62 = vpop.f32.mrb[3].mxu0  ;;  %v707_v63 = vpop.f32.mrb[3].mxu1  ;;  %v271_v52 = vld [vmem:[#allocation2 + $0x38] sm:$0xff] }
 0x106   : > { %v287_v53 = vld [vmem:[#allocation2 + $0xb8] sm:$0xff] }
 0x107   : > { %799 = vst.msk [vmem:[#allocation2 + $0x8] sm:$0xff] %vm231_vm0, %v766_v60  ;;  %815 = vst.msk [vmem:[#allocation2 + $0x88] sm:$0xff] %vm231_vm0, %v782_v61 }
 0x10a   : > { %v646_v2 = vpop.f32.mrb[4].mxu0  ;;  %v710_v3 = vpop.f32.mrb[4].mxu1 }
 0x10b   : > { %v767_v6 = vadd.f32 %v646_v2, %v266_v0  ;;  %v783_v7 = vadd.f32 %v710_v3, %v282_v1  ;;  %v648_v8 = vpop.f32.mrb[5].mxu0  ;;  %v712_v9 = vpop.f32.mrb[5].mxu1 }
 0x10c   : > { %v833_v10 = vld [vmem:[#allocation2] sm:$0xff]  ;;  %v649_v12 = vpop.f32.mrb[6].mxu0  ;;  %v713_v13 = vpop.f32.mrb[6].mxu1 }
 0x10d   : > { %v849_v11 = vld [vmem:[#allocation2 + $0x80] sm:$0xff]  ;;  %v1232_v14 = vpack.c.bf16 %v833_v10, %v833_v10  ;;  %800 = vst.msk [vmem:[#allocation2 + $0x10] sm:$0xff] %vm231_vm0, %v767_v6  ;;  %816 = vst.msk [vmem:[#allocation2 + $0x90] sm:$0xff] %vm231_vm0, %v783_v7  ;;  %v768_v16 = vadd.f32 %v649_v12, %v267_v4  ;;  %v784_v17 = vadd.f32 %v713_v13, %v283_v5  ;;  %v651_v18 = vpop.f32.mrb[7].mxu0  ;;  %v715_v19 = vpop.f32.mrb[7].mxu1  ;;  %v273_v12 = vld [vmem:[#allocation2 + $0x48] sm:$0xff] }
 0x10e   : > { %v1248_v15 = vpack.c.bf16 %v849_v11, %v849_v11  ;;  %v834_v20 = vld [vmem:[#allocation2 + $0x8] sm:$0xff]  ;;  %v272_v8 = vld [vmem:[#allocation2 + $0x40] sm:$0xff] }
 0x10f   : > { %v850_v21 = vld [vmem:[#allocation2 + $0x88] sm:$0xff]  ;;  %994 = vst.msk [vmem:[%s1577_s16] sm:$0xf] %vm993_vm4, %v1232_v14  ;;  %v1233_v22 = vpack.c.bf16 %v834_v20, %v834_v20  ;;  %v288_v9 = vld [vmem:[#allocation2 + $0xc0] sm:$0xff] }
 0x110   : > { %1010 = vst.msk [vmem:[%s1577_s16 + $0x40] sm:$0xf] %vm993_vm4, %v1248_v15  ;;  %v1249_v23 = vpack.c.bf16 %v850_v21, %v850_v21  ;;  %v289_v13 = vld [vmem:[#allocation2 + $0xc8] sm:$0xff] }
 0x111   : > { %801 = vst.msk [vmem:[#allocation2 + $0x18] sm:$0xff] %vm231_vm0, %v768_v16  ;;  %817 = vst.msk [vmem:[#allocation2 + $0x98] sm:$0xff] %vm231_vm0, %v784_v17 }
 0x112   : > { %995 = vst.msk [vmem:[%s1577_s16 + $0x4] sm:$0xf] %vm993_vm4, %v1233_v22  ;;  %1011 = vst.msk [vmem:[%s1577_s16 + $0x44] sm:$0xf] %vm993_vm4, %v1249_v23  ;;  %v654_v26 = vpop.f32.mrb[8].mxu0  ;;  %v718_v27 = vpop.f32.mrb[8].mxu1 }
 0x113   : > { %v769_v30 = vadd.f32 %v654_v26, %v268_v24  ;;  %v785_v31 = vadd.f32 %v718_v27, %v284_v25  ;;  %v656_v32 = vpop.f32.mrb[9].mxu0  ;;  %v720_v33 = vpop.f32.mrb[9].mxu1 }
 0x114   : > { %v835_v34 = vld [vmem:[#allocation2 + $0x10] sm:$0xff]  ;;  %v657_v36 = vpop.f32.mrb[10].mxu0  ;;  %v721_v37 = vpop.f32.mrb[10].mxu1 }
 0x115   : > { %v851_v35 = vld [vmem:[#allocation2 + $0x90] sm:$0xff]  ;;  %v1234_v38 = vpack.c.bf16 %v835_v34, %v835_v34  ;;  %802 = vst.msk [vmem:[#allocation2 + $0x20] sm:$0xff] %vm231_vm0, %v769_v30  ;;  %818 = vst.msk [vmem:[#allocation2 + $0xa0] sm:$0xff] %vm231_vm0, %v785_v31  ;;  %v770_v40 = vadd.f32 %v657_v36, %v269_v28  ;;  %v786_v41 = vadd.f32 %v721_v37, %v285_v29  ;;  %v659_v42 = vpop.f32.mrb[11].mxu0  ;;  %v723_v43 = vpop.f32.mrb[11].mxu1  ;;  %v275_v36 = vld [vmem:[#allocation2 + $0x58] sm:$0xff] }
 0x116   : > { %v1250_v39 = vpack.c.bf16 %v851_v35, %v851_v35  ;;  %v274_v32 = vld [vmem:[#allocation2 + $0x50] sm:$0xff]  ;;  %v291_v37 = vld [vmem:[#allocation2 + $0xd8] sm:$0xff] }
 0x117   : > { %996 = vst.msk [vmem:[%s1577_s16 + $0x8] sm:$0xf] %vm993_vm4, %v1234_v38  ;;  %v290_v33 = vld [vmem:[#allocation2 + $0xd0] sm:$0xff] }
 0x118   : > { %v836_v44 = vld [vmem:[#allocation2 + $0x18] sm:$0xff]  ;;  %1012 = vst.msk [vmem:[%s1577_s16 + $0x48] sm:$0xf] %vm993_vm4, %v1250_v39 }
 0x119   : > { %v852_v45 = vld [vmem:[#allocation2 + $0x98] sm:$0xff]  ;;  %v1235_v46 = vpack.c.bf16 %v836_v44, %v836_v44  ;;  %803 = vst.msk [vmem:[#allocation2 + $0x28] sm:$0xff] %vm231_vm0, %v770_v40  ;;  %819 = vst.msk [vmem:[#allocation2 + $0xa8] sm:$0xff] %vm231_vm0, %v786_v41 }
 0x11a   : > { %v1251_v47 = vpack.c.bf16 %v852_v45, %v852_v45  ;;  %v662_v50 = vpop.f32.mrb[12].mxu0  ;;  %v726_v51 = vpop.f32.mrb[12].mxu1 }
 0x11b   : > { %997 = vst.msk [vmem:[%s1577_s16 + $0xc] sm:$0xf] %vm993_vm4, %v1235_v46  ;;  %v771_v54 = vadd.f32 %v662_v50, %v270_v48  ;;  %v787_v55 = vadd.f32 %v726_v51, %v286_v49  ;;  %v664_v56 = vpop.f32.mrb[13].mxu0  ;;  %v728_v57 = vpop.f32.mrb[13].mxu1 }
 0x11c   : > { %1013 = vst.msk [vmem:[%s1577_s16 + $0x4c] sm:$0xf] %vm993_vm4, %v1251_v47  ;;  %v837_v58 = vld [vmem:[#allocation2 + $0x20] sm:$0xff]  ;;  %v665_v60 = vpop.f32.mrb[14].mxu0  ;;  %v729_v61 = vpop.f32.mrb[14].mxu1 }
 0x11d   : > { %v853_v59 = vld [vmem:[#allocation2 + $0xa0] sm:$0xff]  ;;  %v1236_v62 = vpack.c.bf16 %v837_v58, %v837_v58  ;;  %804 = vst.msk [vmem:[#allocation2 + $0x30] sm:$0xff] %vm231_vm0, %v771_v54  ;;  %820 = vst.msk [vmem:[#allocation2 + $0xb0] sm:$0xff] %vm231_vm0, %v787_v55  ;;  %v772_v0 = vadd.f32 %v665_v60, %v271_v52  ;;  %v788_v1 = vadd.f32 %v729_v61, %v287_v53  ;;  %v667_v2 = vpop.f32.mrb[15].mxu0  ;;  %v731_v3 = vpop.f32.mrb[15].mxu1  ;;  %v277_v60 = vld [vmem:[#allocation2 + $0x68] sm:$0xff] }
 0x11e   : > { %v1252_v63 = vpack.c.bf16 %v853_v59, %v853_v59  ;;  %v276_v56 = vld [vmem:[#allocation2 + $0x60] sm:$0xff]  ;;  %v293_v61 = vld [vmem:[#allocation2 + $0xe8] sm:$0xff] }
 0x11f   : > { %998 = vst.msk [vmem:[%s1577_s16 + $0x10] sm:$0xf] %vm993_vm4, %v1236_v62  ;;  %v292_v57 = vld [vmem:[#allocation2 + $0xe0] sm:$0xff] }
 0x120   : > { %v838_v4 = vld [vmem:[#allocation2 + $0x28] sm:$0xff]  ;;  %1014 = vst.msk [vmem:[%s1577_s16 + $0x50] sm:$0xf] %vm993_vm4, %v1252_v63 }
 0x121   : > { %v854_v5 = vld [vmem:[#allocation2 + $0xa8] sm:$0xff]  ;;  %v1237_v6 = vpack.c.bf16 %v838_v4, %v838_v4  ;;  %805 = vst.msk [vmem:[#allocation2 + $0x38] sm:$0xff] %vm231_vm0, %v772_v0  ;;  %821 = vst.msk [vmem:[#allocation2 + $0xb8] sm:$0xff] %vm231_vm0, %v788_v1 }
 0x122   : > { %v1253_v7 = vpack.c.bf16 %v854_v5, %v854_v5  ;;  %v670_v10 = vpop.f32.mrb[16].mxu0  ;;  %v734_v11 = vpop.f32.mrb[16].mxu1 }
 0x123   : > { %999 = vst.msk [vmem:[%s1577_s16 + $0x14] sm:$0xf] %vm993_vm4, %v1237_v6  ;;  %v773_v14 = vadd.f32 %v670_v10, %v272_v8  ;;  %v789_v15 = vadd.f32 %v734_v11, %v288_v9  ;;  %v672_v16 = vpop.f32.mrb[17].mxu0  ;;  %v736_v17 = vpop.f32.mrb[17].mxu1 }
 0x124   : > { %1015 = vst.msk [vmem:[%s1577_s16 + $0x54] sm:$0xf] %vm993_vm4, %v1253_v7  ;;  %v839_v18 = vld [vmem:[#allocation2 + $0x30] sm:$0xff]  ;;  %v673_v20 = vpop.f32.mrb[18].mxu0  ;;  %v737_v21 = vpop.f32.mrb[18].mxu1 }
 0x125   : > { %v855_v19 = vld [vmem:[#allocation2 + $0xb0] sm:$0xff]  ;;  %v1238_v22 = vpack.c.bf16 %v839_v18, %v839_v18  ;;  %806 = vst.msk [vmem:[#allocation2 + $0x40] sm:$0xff] %vm231_vm0, %v773_v14  ;;  %822 = vst.msk [vmem:[#allocation2 + $0xc0] sm:$0xff] %vm231_vm0, %v789_v15  ;;  %v774_v24 = vadd.f32 %v673_v20, %v273_v12  ;;  %v790_v25 = vadd.f32 %v737_v21, %v289_v13  ;;  %v675_v26 = vpop.f32.mrb[19].mxu0  ;;  %v739_v27 = vpop.f32.mrb[19].mxu1  ;;  %v279_v20 = vld [vmem:[#allocation2 + $0x78] sm:$0xff] }
 0x126   : > { %v1254_v23 = vpack.c.bf16 %v855_v19, %v855_v19  ;;  %v278_v16 = vld [vmem:[#allocation2 + $0x70] sm:$0xff]  ;;  %v295_v21 = vld [vmem:[#allocation2 + $0xf8] sm:$0xff] }
 0x127   : > { %1000 = vst.msk [vmem:[%s1577_s16 + $0x18] sm:$0xf] %vm993_vm4, %v1238_v22  ;;  %v294_v17 = vld [vmem:[#allocation2 + $0xf0] sm:$0xff] }
 0x128   : > { %v840_v28 = vld [vmem:[#allocation2 + $0x38] sm:$0xff]  ;;  %1016 = vst.msk [vmem:[%s1577_s16 + $0x58] sm:$0xf] %vm993_vm4, %v1254_v23 }
 0x129   : > { %v856_v29 = vld [vmem:[#allocation2 + $0xb8] sm:$0xff]  ;;  %v1239_v30 = vpack.c.bf16 %v840_v28, %v840_v28  ;;  %807 = vst.msk [vmem:[#allocation2 + $0x48] sm:$0xff] %vm231_vm0, %v774_v24  ;;  %823 = vst.msk [vmem:[#allocation2 + $0xc8] sm:$0xff] %vm231_vm0, %v790_v25 }
 0x12a   : > { %v1255_v31 = vpack.c.bf16 %v856_v29, %v856_v29  ;;  %v678_v34 = vpop.f32.mrb[20].mxu0  ;;  %v742_v35 = vpop.f32.mrb[20].mxu1 }
 0x12b   : > { %1001 = vst.msk [vmem:[%s1577_s16 + $0x1c] sm:$0xf] %vm993_vm4, %v1239_v30  ;;  %v775_v38 = vadd.f32 %v678_v34, %v274_v32  ;;  %v791_v39 = vadd.f32 %v742_v35, %v290_v33  ;;  %v680_v40 = vpop.f32.mrb[21].mxu0  ;;  %v744_v41 = vpop.f32.mrb[21].mxu1 }
 0x12c   : > { %1017 = vst.msk [vmem:[%s1577_s16 + $0x5c] sm:$0xf] %vm993_vm4, %v1255_v31  ;;  %v841_v42 = vld [vmem:[#allocation2 + $0x40] sm:$0xff]  ;;  %v681_v44 = vpop.f32.mrb[22].mxu0  ;;  %v745_v45 = vpop.f32.mrb[22].mxu1 }
 0x12d   : > { %v857_v43 = vld [vmem:[#allocation2 + $0xc0] sm:$0xff]  ;;  %v1240_v46 = vpack.c.bf16 %v841_v42, %v841_v42  ;;  %808 = vst.msk [vmem:[#allocation2 + $0x50] sm:$0xff] %vm231_vm0, %v775_v38  ;;  %824 = vst.msk [vmem:[#allocation2 + $0xd0] sm:$0xff] %vm231_vm0, %v791_v39  ;;  %v776_v48 = vadd.f32 %v681_v44, %v275_v36  ;;  %v792_v49 = vadd.f32 %v745_v45, %v291_v37  ;;  %v683_v50 = vpop.f32.mrb[23].mxu0  ;;  %v747_v51 = vpop.f32.mrb[23].mxu1 }
 0x12e   : > { %v1256_v47 = vpack.c.bf16 %v857_v43, %v857_v43 }
 0x12f   : > { %1002 = vst.msk [vmem:[%s1577_s16 + $0x20] sm:$0xf] %vm993_vm4, %v1240_v46 }
 0x130   : > { %v842_v52 = vld [vmem:[#allocation2 + $0x48] sm:$0xff]  ;;  %1018 = vst.msk [vmem:[%s1577_s16 + $0x60] sm:$0xf] %vm993_vm4, %v1256_v47 }
 0x131   : > { %v858_v53 = vld [vmem:[#allocation2 + $0xc8] sm:$0xff]  ;;  %v1241_v54 = vpack.c.bf16 %v842_v52, %v842_v52  ;;  %809 = vst.msk [vmem:[#allocation2 + $0x58] sm:$0xff] %vm231_vm0, %v776_v48  ;;  %825 = vst.msk [vmem:[#allocation2 + $0xd8] sm:$0xff] %vm231_vm0, %v792_v49 }
 0x132   : > { %v1257_v55 = vpack.c.bf16 %v858_v53, %v858_v53  ;;  %v686_v58 = vpop.f32.mrb[24].mxu0  ;;  %v750_v59 = vpop.f32.mrb[24].mxu1 }
 0x133   : > { %1003 = vst.msk [vmem:[%s1577_s16 + $0x24] sm:$0xf] %vm993_vm4, %v1241_v54  ;;  %v777_v62 = vadd.f32 %v686_v58, %v276_v56  ;;  %v793_v63 = vadd.f32 %v750_v59, %v292_v57  ;;  %v688_v0 = vpop.f32.mrb[25].mxu0  ;;  %v752_v1 = vpop.f32.mrb[25].mxu1 }
 0x134   : > { %1019 = vst.msk [vmem:[%s1577_s16 + $0x64] sm:$0xf] %vm993_vm4, %v1257_v55  ;;  %v843_v2 = vld [vmem:[#allocation2 + $0x50] sm:$0xff]  ;;  %v689_v4 = vpop.f32.mrb[26].mxu0  ;;  %v753_v5 = vpop.f32.mrb[26].mxu1 }
 0x135   : > { %v859_v3 = vld [vmem:[#allocation2 + $0xd0] sm:$0xff]  ;;  %v1242_v6 = vpack.c.bf16 %v843_v2, %v843_v2  ;;  %810 = vst.msk [vmem:[#allocation2 + $0x60] sm:$0xff] %vm231_vm0, %v777_v62  ;;  %826 = vst.msk [vmem:[#allocation2 + $0xe0] sm:$0xff] %vm231_vm0, %v793_v63  ;;  %v778_v8 = vadd.f32 %v689_v4, %v277_v60  ;;  %v794_v9 = vadd.f32 %v753_v5, %v293_v61  ;;  %v691_v10 = vpop.f32.mrb[27].mxu0  ;;  %v755_v11 = vpop.f32.mrb[27].mxu1 }
 0x136   : > { %v1258_v7 = vpack.c.bf16 %v859_v3, %v859_v3 }
 0x137   : > { %1004 = vst.msk [vmem:[%s1577_s16 + $0x28] sm:$0xf] %vm993_vm4, %v1242_v6 }
 0x138   : > { %v844_v12 = vld [vmem:[#allocation2 + $0x58] sm:$0xff]  ;;  %1020 = vst.msk [vmem:[%s1577_s16 + $0x68] sm:$0xf] %vm993_vm4, %v1258_v7 }
 0x139   : > { %v860_v13 = vld [vmem:[#allocation2 + $0xd8] sm:$0xff]  ;;  %v1243_v14 = vpack.c.bf16 %v844_v12, %v844_v12  ;;  %811 = vst.msk [vmem:[#allocation2 + $0x68] sm:$0xff] %vm231_vm0, %v778_v8  ;;  %827 = vst.msk [vmem:[#allocation2 + $0xe8] sm:$0xff] %vm231_vm0, %v794_v9 }
 0x13a   : > { %v1259_v15 = vpack.c.bf16 %v860_v13, %v860_v13  ;;  %v694_v18 = vpop.f32.mrb[28].mxu0  ;;  %v758_v19 = vpop.f32.mrb[28].mxu1 }
 0x13b   : > { %1005 = vst.msk [vmem:[%s1577_s16 + $0x2c] sm:$0xf] %vm993_vm4, %v1243_v14  ;;  %v779_v22 = vadd.f32 %v694_v18, %v278_v16  ;;  %v795_v23 = vadd.f32 %v758_v19, %v294_v17  ;;  %v696_v24 = vpop.f32.mrb[29].mxu0  ;;  %v760_v25 = vpop.f32.mrb[29].mxu1 }
 0x13c   : > { %1021 = vst.msk [vmem:[%s1577_s16 + $0x6c] sm:$0xf] %vm993_vm4, %v1259_v15  ;;  %v845_v26 = vld [vmem:[#allocation2 + $0x60] sm:$0xff]  ;;  %v697_v28 = vpop.f32.mrb[30].mxu0  ;;  %v761_v29 = vpop.f32.mrb[30].mxu1 }
 0x13d   : > { %v861_v27 = vld [vmem:[#allocation2 + $0xe0] sm:$0xff]  ;;  %v1244_v30 = vpack.c.bf16 %v845_v26, %v845_v26  ;;  %812 = vst.msk [vmem:[#allocation2 + $0x70] sm:$0xff] %vm231_vm0, %v779_v22  ;;  %828 = vst.msk [vmem:[#allocation2 + $0xf0] sm:$0xff] %vm231_vm0, %v795_v23  ;;  %v780_v32 = vadd.f32 %v697_v28, %v279_v20  ;;  %v796_v33 = vadd.f32 %v761_v29, %v295_v21  ;;  %v699_v34 = vpop.f32.mrb[31].mxu0  ;;  %v763_v35 = vpop.f32.mrb[31].mxu1 }
 0x13e   : > { %v1260_v31 = vpack.c.bf16 %v861_v27, %v861_v27 }
 0x13f   : > { %1006 = vst.msk [vmem:[%s1577_s16 + $0x30] sm:$0xf] %vm993_vm4, %v1244_v30 }
 0x140   : > { %v846_v36 = vld [vmem:[#allocation2 + $0x68] sm:$0xff]  ;;  %1022 = vst.msk [vmem:[%s1577_s16 + $0x70] sm:$0xf] %vm993_vm4, %v1260_v31 }
 0x141   : > { %v862_v37 = vld [vmem:[#allocation2 + $0xe8] sm:$0xff]  ;;  %v1245_v38 = vpack.c.bf16 %v846_v36, %v846_v36  ;;  %813 = vst.msk [vmem:[#allocation2 + $0x78] sm:$0xff] %vm231_vm0, %v780_v32  ;;  %829 = vst.msk [vmem:[#allocation2 + $0xf8] sm:$0xff] %vm231_vm0, %v796_v33 }
 0x142   : > { %v1261_v39 = vpack.c.bf16 %v862_v37, %v862_v37 }
 0x143   : > { %1007 = vst.msk [vmem:[%s1577_s16 + $0x34] sm:$0xf] %vm993_vm4, %v1245_v38 }
 0x144   : > { %1023 = vst.msk [vmem:[%s1577_s16 + $0x74] sm:$0xf] %vm993_vm4, %v1261_v39  ;;  %v847_v40 = vld [vmem:[#allocation2 + $0x70] sm:$0xff] }
 0x145   : > { %v863_v41 = vld [vmem:[#allocation2 + $0xf0] sm:$0xff]  ;;  %v1246_v42 = vpack.c.bf16 %v847_v40, %v847_v40 }
 0x146   : > { %v1262_v43 = vpack.c.bf16 %v863_v41, %v863_v41 }
 0x147   : > { %1008 = vst.msk [vmem:[%s1577_s16 + $0x38] sm:$0xf] %vm993_vm4, %v1246_v42 }
 0x148   : > { %v848_v44 = vld [vmem:[#allocation2 + $0x78] sm:$0xff]  ;;  %1024 = vst.msk [vmem:[%s1577_s16 + $0x78] sm:$0xf] %vm993_vm4, %v1262_v43 }
 0x149   : > { %v864_v45 = vld [vmem:[#allocation2 + $0xf8] sm:$0xff]  ;;  %v1247_v46 = vpack.c.bf16 %v848_v44, %v848_v44 }
 0x14a   : > { %v1263_v47 = vpack.c.bf16 %v864_v45, %v864_v45 }
 0x14b   : > { %1009 = vst.msk [vmem:[%s1577_s16 + $0x3c] sm:$0xf] %vm993_vm4, %v1247_v46 }
 0x14c   : > { %1025 = vst.msk [vmem:[%s1577_s16 + $0x7c] sm:$0xf] %vm993_vm4, %v1263_v47 }
 0x14d PF: > { %s12_s11 = sadd.s32 1, %s1391_s11   ;;  %s1683_s9 = smov %s1387_s10 }
 0x14e   : > { %p9_p5 = scmp.ge.s32.totalorder %s12_s11, 4   ;;  %s1684_s10 = smov %s1686_s12 }
 0x150   :  { %11 = sbr.rel (!%p9_p5) target bundleno = 2 (0x2), region = 69 }

</bundles_post_ra>
